<compile_context>
chip_gen: v7x
topology: tpu7x:2x2x1
jax: 0.10.0
libtpu: 0.0.40
codegen_flags: <defaults>
</compile_context>

<pallas_src>
import math

import jax
import jax.numpy as jnp
from jax import lax
from jax.experimental import pallas as pl
from jax.experimental.pallas import tpu as pltpu

# --- encoder hyper-parameters (small, synthetic) -----------------------------
C_IN   = 1      # raw-signal channels
C1     = 16
C2     = 32
N_OUT  = 5      # len(seqdist.alphabet), e.g. "NACGT"
NCLS   = 8      # N_OUT padded to a full sublane group for the classifier tile
K      = 5      # conv kernel width
STRIDE = 2
PAD    = 2

LANE_BUDGET = 8192          # target lane width per grid step (VMEM sizing)
MM_DTYPE    = jnp.float32   # jnp.bfloat16 on v6e/v7x for production (relax tol)


def _silu(x):
    return x * jax.nn.sigmoid(x)


# --- Pallas kernel: whole encoder forward for one batch block -----------------
def _make_encoder_kernel(TP, T1e, T1o, L):
    """Encoder kernel for one batch block; all sizes are static via closure.

    Layout: channels on sublanes, time (with batch folded in) on lanes.
      xph : (1, 4, L)        4-phase de-interleaved raw signal, halo cols per elem
      w1s : (4*C1, 4)        conv1 tap groups [even@0 ; even@-1 ; odd@0 ; odd@+1]
      w2e : (3*C2, C1)       conv2 taps acting on the even phase [k=0 ; k=2 ; k=4]
      w2o : (2*C2, C1)       conv2 taps acting on the odd  phase [k=1 ; k=3]
      wop : (NCLS, C2)       classifier weights (rows >= N_OUT are zero)
      bcat: (C1+C2+NCLS, 1)  biases [b1 ; b2 ; bo (pad rows = -1e30)]
      out : (1, N_OUT, L)    log-softmax scores, time on lanes
    """

    def kernel(xph_ref, w1s_ref, w2e_ref, w2o_ref, wop_ref, bcat_ref, out_ref):
        xph = xph_ref[0]                                            # (4, L)

        # Per-segment column index j; conv1 phase-time s = j - 1.  Halo masks
        # zero the s = -1 column and the columns past the valid phase length.
        j = lax.broadcasted_iota(jnp.int32, (1, L), 1) % TP
        s = j - 1
        mask_e = (s >= 0) & (s < T1e)
        mask_o = (s >= 0) & (s < T1o)

        bcat = bcat_ref[...]
        b1 = bcat[0:C1]
        b2 = bcat[C1:C1 + C2]
        bo = bcat[C1 + C2:C1 + C2 + NCLS]

        def mm(w, v):
            return jnp.dot(w.astype(MM_DTYPE), v.astype(MM_DTYPE),
                           preferred_element_type=jnp.float32)

        # ---- Conv1 (k=5, stride 2) + SiLU: one matmul over the 4 phase rows;
        # the +/-1 column taps come back via XLU rolls of the MXU output.
        y1 = mm(w1s_ref[...], xph)                                  # (4*C1, L)
        he = y1[0:C1] + pltpu.roll(y1[C1:2 * C1], 1, axis=1) + b1
        ho = (y1[2 * C1:3 * C1]
              + pltpu.roll(y1[3 * C1:4 * C1], L - 1, axis=1) + b1)
        he = jnp.where(mask_e, _silu(he), 0.0)                      # even phase
        ho = jnp.where(mask_o, _silu(ho), 0.0)                      # odd  phase

        # ---- Conv2 (k=5, stride 2) + SiLU: two matmuls on tap-stacked
        # weights; no (K*C1, T) taps buffer -- alignment via output rolls.
        ye = mm(w2e_ref[...], he)                                   # (3*C2, L)
        yo = mm(w2o_ref[...], ho)                                   # (2*C2, L)
        s1 = ye[C2:2 * C2] + yo[C2:2 * C2]
        h2 = _silu(ye[0:C2] + yo[0:C2]
                   + pltpu.roll(s1, L - 1, axis=1)
                   + pltpu.roll(ye[2 * C2:3 * C2], L - 2, axis=1)
                   + b2)                                            # (C2, L)

        # ---- Linear to (padded) alphabet + log-softmax over classes ----
        logits = mm(wop_ref[...], h2) + bo                          # (NCLS, L)
        m = jnp.max(logits, axis=0, keepdims=True)
        z = logits - m
        lse = jnp.log(jnp.sum(jnp.exp(z), axis=0, keepdims=True))
        out_ref[...] = (z - lse)[:N_OUT][None]                      # (1, N_OUT, L)

    return kernel


# --- wrapper ------------------------------------------------------------------
def seqdist_forward(x_ncw, kernel_params):
    """x_ncw: (N, 1, T) float32, PyTorch NCW layout.  Returns (T', N, N_OUT)."""
    w1s, w2e, w2o, wop, bcat = kernel_params
    N, c_in, T = x_ncw.shape
    assert c_in == C_IN == 1

    T1 = (T + 2 * PAD - K) // STRIDE + 1        # conv1 output length
    T2 = (T1 + 2 * PAD - K) // STRIDE + 1       # conv2 output length
    T1e = (T1 + 1) // 2                         # even-phase conv1 outputs (== T2)
    T1o = T1 // 2                               # odd-phase conv1 outputs
    assert T1e == T2
    TP = T2 + 2                                 # per-element segment width (halo)

    # Batch blocking: fold B_BLK elements onto the lane axis of one grid step.
    B_BLK = max(1, min(8, LANE_BUDGET // TP))
    NB = (N + B_BLK - 1) // B_BLK
    NPAD = NB * B_BLK
    L = B_BLK * TP

    # 4-phase de-interleave (one pad + reshape): xph[n, p, j] = x[n, 4*(j-1)+p],
    # zero outside [0, T).  Column j=0 is the left halo, j>=T2 the right halo.
    x = x_ncw[:, 0, :].astype(jnp.float32)                          # (N, T)
    x_pad = jnp.pad(x, ((0, NPAD - N), (4, 4 * TP - 4 - T)))        # (NPAD, 4*TP)
    xph = (x_pad.reshape(NB, B_BLK, TP, 4)
           .transpose(0, 3, 1, 2)
           .reshape(NB, 4, L))                                      # (NB, 4, L)

    out = pl.pallas_call(
        _make_encoder_kernel(TP, T1e, T1o, L),
        out_shape=jax.ShapeDtypeStruct((NB, N_OUT, L), jnp.float32),
        grid=(NB,),
        in_specs=[
            pl.BlockSpec((1, 4, L),            lambda nb: (nb, 0, 0)),
            pl.BlockSpec((4 * C1, 4),          lambda nb: (0, 0)),
            pl.BlockSpec((3 * C2, C1),         lambda nb: (0, 0)),
            pl.BlockSpec((2 * C2, C1),         lambda nb: (0, 0)),
            pl.BlockSpec((NCLS, C2),           lambda nb: (0, 0)),
            pl.BlockSpec((C1 + C2 + NCLS, 1),  lambda nb: (0, 0)),
        ],
        out_specs=pl.BlockSpec((1, N_OUT, L), lambda nb: (nb, 0, 0)),
        compiler_params=pltpu.CompilerParams(
            # batch blocks are independent; on v7x use pltpu.CORE_PARALLEL here
            dimension_semantics=("parallel",),
            vmem_limit_bytes=32 * 1024 * 1024),
    )(xph, w1s, w2e, w2o, wop, bcat)

    # Keep the valid T2 columns of each batch segment; restore bonito (T', N, C).
    out = out.reshape(NB, N_OUT, B_BLK, TP)[:, :, :, :T2]
    scores = (jnp.transpose(out, (3, 0, 2, 1))
              .reshape(T2, NPAD, N_OUT)[:, :N, :])
    return scores


# --- parameter packing: PyTorch layouts -> kernel operands --------------------
def pack_params(pt_params):
    w1_pt, b1_pt, w2_pt, b2_pt, wo_pt, bo_pt = pt_params
    f32 = jnp.float32
    w1 = w1_pt[:, 0, :].astype(f32)                                  # (C1, K)
    z = jnp.zeros((C1,), f32)
    # conv1 tap groups; columns = input phases 0..3
    w_e0  = jnp.stack([w1[:, 2], w1[:, 3], w1[:, 4], z], axis=1)     # even, offset 0
    w_em1 = jnp.stack([z, z, w1[:, 0], w1[:, 1]], axis=1)            # even, offset -1
    w_o0  = jnp.stack([w1[:, 0], w1[:, 1], w1[:, 2], w1[:, 3]], axis=1)
    w_op1 = jnp.stack([w1[:, 4], z, z, z], axis=1)                   # odd,  offset +1
    w1s = jnp.concatenate([w_e0, w_em1, w_o0, w_op1], axis=0)        # (4*C1, 4)

    w2 = w2_pt.astype(f32)                                           # (C2, C1, K)
    w2e = jnp.concatenate([w2[:, :, 0], w2[:, :, 2], w2[:, :, 4]], axis=0)  # (3*C2, C1)
    w2o = jnp.concatenate([w2[:, :, 1], w2[:, :, 3]], axis=0)               # (2*C2, C1)

    wop = jnp.concatenate(
        [wo_pt.astype(f32), jnp.zeros((NCLS - N_OUT, C2), f32)], axis=0)    # (NCLS, C2)
    bo_pad = jnp.concatenate(
        [bo_pt.astype(f32), jnp.full((NCLS - N_OUT,), -1e30, f32)])
    bcat = jnp.concatenate(
        [b1_pt.astype(f32), b2_pt.astype(f32), bo_pad]).reshape(-1, 1)      # (56, 1)
    return w1s, w2e, w2o, wop, bcat


# --- pure-JAX reference (PyTorch semantics) ----------------------------------
def reference(x_ncw, pt_params):
    w1, b1, w2, b2, wo, bo = pt_params   # PyTorch layouts: (O, I, K), (O,), (O, I)
    y = lax.conv_general_dilated(x_ncw, w1, (STRIDE,), [(PAD, PAD)],
                                 dimension_numbers=("NCH", "OIH", "NCH"))
    y = _silu(y + b1[None, :, None])
    y = lax.conv_general_dilated(y, w2, (STRIDE,), [(PAD, PAD)],
                                 dimension_numbers=("NCH", "OIH", "NCH"))
    y = _silu(y + b2[None, :, None])
    y = jnp.einsum("nct,oc->nto", y, wo) + bo[None, None, :]
    y = jax.nn.log_softmax(y, axis=-1)
    return jnp.transpose(y, (1, 0, 2))   # (T', N, C)


if __name__ == "__main__":
    key = jax.random.PRNGKey(0)
    kw, kx1, kx2 = jax.random.split(key, 3)
    k1, k2, k3, k4, k5, k6 = jax.random.split(kw, 6)

    # deterministic parameter init (PyTorch layouts)
    w1_pt = jax.random.normal(k1, (C1, C_IN, K), jnp.float32) / math.sqrt(C_IN * K)
    b1_pt = jax.random.normal(k2, (C1,), jnp.float32) * 0.1
    w2_pt = jax.random.normal(k3, (C2, C1, K), jnp.float32) / math.sqrt(C1 * K)
    b2_pt = jax.random.normal(k4, (C2,), jnp.float32) * 0.1
    wo_pt = jax.random.normal(k5, (N_OUT, C2), jnp.float32) / math.sqrt(C2)
    bo_pt = jax.random.normal(k6, (N_OUT,), jnp.float32) * 0.1
    pt_params = (w1_pt, b1_pt, w2_pt, b2_pt, wo_pt, bo_pt)
    kernel_params = pack_params(pt_params)

    # Small shapes.  Second case exercises odd conv1 length (T1o < T1e) and
    # batch padding inside a block.
    for n, t, kx in ((2, 16, kx1), (3, 37, kx2)):
        x = jax.random.normal(kx, (n, C_IN, t), jnp.float32)    # PyTorch NCW input
        y = jax.block_until_ready(seqdist_forward(x, kernel_params))
        y_ref = reference(x, pt_params)
        assert y.shape == ((t + 3) // 4, n, N_OUT), y.shape     # stride-4 encoder
        assert y.shape == y_ref.shape, (y.shape, y_ref.shape)
        assert jnp.allclose(y, y_ref, atol=1e-4, rtol=1e-4), f"mismatch N={n} T={t}"

    # TODO(synk): decode_batch / loss (seqdist.viterbi, ctc_loss) are dynamic-
    # programming ops outside the forward pass and are not implemented here.
    print("KERNEL_OK")
</pallas_src>

<mosaic_0001>
module attributes {stable_mosaic.version = 11 : i64} {
  func.func @kernel(%arg0: i32, %arg1: memref<1x4x48xf32, #tpu.memory_space<vmem>>, %arg2: memref<64x4xf32, #tpu.memory_space<vmem>>, %arg3: memref<96x16xf32, #tpu.memory_space<vmem>>, %arg4: memref<64x16xf32, #tpu.memory_space<vmem>>, %arg5: memref<8x32xf32, #tpu.memory_space<vmem>>, %arg6: memref<56x1xf32, #tpu.memory_space<vmem>>, %arg7: memref<1x5x48xf32, #tpu.memory_space<vmem>>) attributes {dimension_semantics = [#tpu.dimension_semantics<parallel>], iteration_bounds = array<i64: 1>, scalar_prefetch = 0 : i64, scratch_operands = 0 : i64, tpu.core_type = #tpu.core_type<tc>, window_params = [{transform_indices = @transform_0, window_bounds = array<i64: 1, 4, 48>}, {pipeline_mode = #tpu.pipeline_mode<synchronous>, transform_indices = @transform_1, window_bounds = array<i64: 64, 4>}, {pipeline_mode = #tpu.pipeline_mode<synchronous>, transform_indices = @transform_2, window_bounds = array<i64: 96, 16>}, {pipeline_mode = #tpu.pipeline_mode<synchronous>, transform_indices = @transform_3, window_bounds = array<i64: 64, 16>}, {pipeline_mode = #tpu.pipeline_mode<synchronous>, transform_indices = @transform_4, window_bounds = array<i64: 8, 32>}, {pipeline_mode = #tpu.pipeline_mode<synchronous>, transform_indices = @transform_5, window_bounds = array<i64: 56, 1>}, {transform_indices = @transform_6, window_bounds = array<i64: 1, 5, 48>}]} {
    %c0 = arith.constant 0 : index
    %c0_0 = arith.constant 0 : index
    %c0_1 = arith.constant 0 : index
    %0 = vector.load %arg1[%c0, %c0_0, %c0_1] : memref<1x4x48xf32, #tpu.memory_space<vmem>>, vector<1x4x48xf32>
    %1 = vector.shape_cast %0 : vector<1x4x48xf32> to vector<4x48xf32>
    %2 = tpu.iota {dimensions = array<i32: 1>} : vector<1x48xi32>
    %c6_i32 = arith.constant 6 : i32
    %c0_i32 = arith.constant 0 : i32
    %3 = arith.cmpi eq, %c6_i32, %c0_i32 : i32
    %c1_i32 = arith.constant 1 : i32
    %4 = arith.select %3, %c1_i32, %c6_i32 : i32
    %5 = vector.broadcast %4 : i32 to vector<1x48xi32>
    %6 = arith.remsi %2, %5 : vector<1x48xi32>
    %c0_i32_2 = arith.constant 0 : i32
    %7 = vector.broadcast %c0_i32_2 : i32 to vector<1x48xi32>
    %8 = arith.cmpi ne, %6, %7 : vector<1x48xi32>
    %c0_i32_3 = arith.constant 0 : i32
    %9 = vector.broadcast %c0_i32_3 : i32 to vector<1x48xi32>
    %10 = arith.cmpi slt, %6, %9 : vector<1x48xi32>
    %c0_i32_4 = arith.constant 0 : i32
    %11 = arith.cmpi slt, %4, %c0_i32_4 : i32
    %12 = vector.broadcast %11 : i1 to vector<1x48xi1>
    %13 = vector.broadcast %12 : vector<1x48xi1> to vector<1x48xi1>
    %14 = arith.xori %10, %13 : vector<1x48xi1>
    %15 = arith.andi %14, %8 : vector<1x48xi1>
    %16 = vector.broadcast %4 : i32 to vector<1x48xi32>
    %17 = arith.addi %6, %16 : vector<1x48xi32>
    %18 = arith.select %15, %17, %6 : vector<1x48xi1>, vector<1x48xi32>
    %c1_i32_5 = arith.constant 1 : i32
    %19 = vector.broadcast %c1_i32_5 : i32 to vector<1x48xi32>
    %20 = arith.subi %18, %19 : vector<1x48xi32>
    %c0_i32_6 = arith.constant 0 : i32
    %21 = vector.broadcast %c0_i32_6 : i32 to vector<1x48xi32>
    %22 = arith.cmpi sge, %20, %21 : vector<1x48xi32>
    %c4_i32 = arith.constant 4 : i32
    %23 = vector.broadcast %c4_i32 : i32 to vector<1x48xi32>
    %24 = arith.cmpi slt, %20, %23 : vector<1x48xi32>
    %25 = arith.andi %22, %24 : vector<1x48xi1>
    %c0_i32_7 = arith.constant 0 : i32
    %26 = vector.broadcast %c0_i32_7 : i32 to vector<1x48xi32>
    %27 = arith.cmpi sge, %20, %26 : vector<1x48xi32>
    %c4_i32_8 = arith.constant 4 : i32
    %28 = vector.broadcast %c4_i32_8 : i32 to vector<1x48xi32>
    %29 = arith.cmpi slt, %20, %28 : vector<1x48xi32>
    %30 = arith.andi %27, %29 : vector<1x48xi1>
    %c0_9 = arith.constant 0 : index
    %c0_10 = arith.constant 0 : index
    %31 = vector.load %arg6[%c0_9, %c0_10] : memref<56x1xf32, #tpu.memory_space<vmem>>, vector<56x1xf32>
    %32 = vector.extract_strided_slice %31 {offsets = [0, 0], sizes = [16, 1], strides = [1, 1]} : vector<56x1xf32> to vector<16x1xf32>
    %33 = vector.extract_strided_slice %31 {offsets = [16, 0], sizes = [32, 1], strides = [1, 1]} : vector<56x1xf32> to vector<32x1xf32>
    %34 = vector.extract_strided_slice %31 {offsets = [48, 0], sizes = [8, 1], strides = [1, 1]} : vector<56x1xf32> to vector<8x1xf32>
    %c0_11 = arith.constant 0 : index
    %c0_12 = arith.constant 0 : index
    %35 = vector.load %arg2[%c0_11, %c0_12] : memref<64x4xf32, #tpu.memory_space<vmem>>, vector<64x4xf32>
    %cst = arith.constant dense<0.000000e+00> : vector<64x48xf32>
    %36 = tpu.matmul %35, %1, %cst {dimension_numbers = #tpu.dot_dimension_numbers<[1], [0], [0], [1], [0, 0, 1, 1], [], []>} : vector<64x4xf32>, vector<4x48xf32>, vector<64x48xf32> -> vector<64x48xf32>
    %37 = vector.extract_strided_slice %36 {offsets = [0, 0], sizes = [16, 48], strides = [1, 1]} : vector<64x48xf32> to vector<16x48xf32>
    %38 = vector.extract_strided_slice %36 {offsets = [16, 0], sizes = [16, 48], strides = [1, 1]} : vector<64x48xf32> to vector<16x48xf32>
    %c1_i32_13 = arith.constant 1 : i32
    %39 = tpu.dynamic_rotate %38 by %c1_i32_13 dim 1 : vector<16x48xf32>, i32 -> vector<16x48xf32>
    %40 = arith.addf %37, %39 : vector<16x48xf32>
    %41 = vector.broadcast %32 : vector<16x1xf32> to vector<16x48xf32>
    %42 = arith.addf %40, %41 : vector<16x48xf32>
    %43 = vector.extract_strided_slice %36 {offsets = [32, 0], sizes = [16, 48], strides = [1, 1]} : vector<64x48xf32> to vector<16x48xf32>
    %44 = vector.extract_strided_slice %36 {offsets = [48, 0], sizes = [16, 48], strides = [1, 1]} : vector<64x48xf32> to vector<16x48xf32>
    %c47_i32 = arith.constant 47 : i32
    %45 = tpu.dynamic_rotate %44 by %c47_i32 dim 1 : vector<16x48xf32>, i32 -> vector<16x48xf32>
    %46 = arith.addf %43, %45 : vector<16x48xf32>
    %47 = vector.broadcast %32 : vector<16x1xf32> to vector<16x48xf32>
    %48 = arith.addf %46, %47 : vector<16x48xf32>
    %49 = arith.negf %42 : vector<16x48xf32>
    %50 = math.exp %49 : vector<16x48xf32>
    %cst_14 = arith.constant 1.000000e+00 : f32
    %51 = vector.broadcast %cst_14 : f32 to vector<16x48xf32>
    %52 = arith.addf %51, %50 : vector<16x48xf32>
    %53 = arith.divf %51, %52 : vector<16x48xf32>
    %54 = arith.mulf %42, %53 : vector<16x48xf32>
    %cst_15 = arith.constant 0.000000e+00 : f32
    %55 = vector.shape_cast %25 : vector<1x48xi1> to vector<1x48xi1>
    %56 = vector.broadcast %55 : vector<1x48xi1> to vector<16x48xi1>
    %57 = vector.broadcast %cst_15 : f32 to vector<16x48xf32>
    %58 = arith.select %56, %54, %57 : vector<16x48xi1>, vector<16x48xf32>
    %59 = arith.negf %48 : vector<16x48xf32>
    %60 = math.exp %59 : vector<16x48xf32>
    %cst_16 = arith.constant 1.000000e+00 : f32
    %61 = vector.broadcast %cst_16 : f32 to vector<16x48xf32>
    %62 = arith.addf %61, %60 : vector<16x48xf32>
    %63 = arith.divf %61, %62 : vector<16x48xf32>
    %64 = arith.mulf %48, %63 : vector<16x48xf32>
    %cst_17 = arith.constant 0.000000e+00 : f32
    %65 = vector.shape_cast %30 : vector<1x48xi1> to vector<1x48xi1>
    %66 = vector.broadcast %65 : vector<1x48xi1> to vector<16x48xi1>
    %67 = vector.broadcast %cst_17 : f32 to vector<16x48xf32>
    %68 = arith.select %66, %64, %67 : vector<16x48xi1>, vector<16x48xf32>
    %c0_18 = arith.constant 0 : index
    %c0_19 = arith.constant 0 : index
    %69 = vector.load %arg3[%c0_18, %c0_19] : memref<96x16xf32, #tpu.memory_space<vmem>>, vector<96x16xf32>
    %cst_20 = arith.constant dense<0.000000e+00> : vector<96x48xf32>
    %70 = tpu.matmul %69, %58, %cst_20 {dimension_numbers = #tpu.dot_dimension_numbers<[1], [0], [0], [1], [0, 0, 1, 1], [], []>} : vector<96x16xf32>, vector<16x48xf32>, vector<96x48xf32> -> vector<96x48xf32>
    %c0_21 = arith.constant 0 : index
    %c0_22 = arith.constant 0 : index
    %71 = vector.load %arg4[%c0_21, %c0_22] : memref<64x16xf32, #tpu.memory_space<vmem>>, vector<64x16xf32>
    %cst_23 = arith.constant dense<0.000000e+00> : vector<64x48xf32>
    %72 = tpu.matmul %71, %68, %cst_23 {dimension_numbers = #tpu.dot_dimension_numbers<[1], [0], [0], [1], [0, 0, 1, 1], [], []>} : vector<64x16xf32>, vector<16x48xf32>, vector<64x48xf32> -> vector<64x48xf32>
    %73 = vector.extract_strided_slice %70 {offsets = [32, 0], sizes = [32, 48], strides = [1, 1]} : vector<96x48xf32> to vector<32x48xf32>
    %74 = vector.extract_strided_slice %72 {offsets = [32, 0], sizes = [32, 48], strides = [1, 1]} : vector<64x48xf32> to vector<32x48xf32>
    %75 = arith.addf %73, %74 : vector<32x48xf32>
    %76 = vector.extract_strided_slice %70 {offsets = [0, 0], sizes = [32, 48], strides = [1, 1]} : vector<96x48xf32> to vector<32x48xf32>
    %77 = vector.extract_strided_slice %72 {offsets = [0, 0], sizes = [32, 48], strides = [1, 1]} : vector<64x48xf32> to vector<32x48xf32>
    %78 = arith.addf %76, %77 : vector<32x48xf32>
    %c47_i32_24 = arith.constant 47 : i32
    %79 = tpu.dynamic_rotate %75 by %c47_i32_24 dim 1 : vector<32x48xf32>, i32 -> vector<32x48xf32>
    %80 = arith.addf %78, %79 : vector<32x48xf32>
    %81 = vector.extract_strided_slice %70 {offsets = [64, 0], sizes = [32, 48], strides = [1, 1]} : vector<96x48xf32> to vector<32x48xf32>
    %c46_i32 = arith.constant 46 : i32
    %82 = tpu.dynamic_rotate %81 by %c46_i32 dim 1 : vector<32x48xf32>, i32 -> vector<32x48xf32>
    %83 = arith.addf %80, %82 : vector<32x48xf32>
    %84 = vector.broadcast %33 : vector<32x1xf32> to vector<32x48xf32>
    %85 = arith.addf %83, %84 : vector<32x48xf32>
    %86 = arith.negf %85 : vector<32x48xf32>
    %87 = math.exp %86 : vector<32x48xf32>
    %cst_25 = arith.constant 1.000000e+00 : f32
    %88 = vector.broadcast %cst_25 : f32 to vector<32x48xf32>
    %89 = arith.addf %88, %87 : vector<32x48xf32>
    %90 = arith.divf %88, %89 : vector<32x48xf32>
    %91 = arith.mulf %85, %90 : vector<32x48xf32>
    %c0_26 = arith.constant 0 : index
    %c0_27 = arith.constant 0 : index
    %92 = vector.load %arg5[%c0_26, %c0_27] : memref<8x32xf32, #tpu.memory_space<vmem>>, vector<8x32xf32>
    %cst_28 = arith.constant dense<0.000000e+00> : vector<8x48xf32>
    %93 = tpu.matmul %92, %91, %cst_28 {dimension_numbers = #tpu.dot_dimension_numbers<[1], [0], [0], [1], [0, 0, 1, 1], [], []>} : vector<8x32xf32>, vector<32x48xf32>, vector<8x48xf32> -> vector<8x48xf32>
    %94 = vector.broadcast %34 : vector<8x1xf32> to vector<8x48xf32>
    %95 = arith.addf %93, %94 : vector<8x48xf32>
    %cst_29 = arith.constant dense<0xFF800000> : vector<48xf32>
    %96 = vector.multi_reduction <maximumf>, %95, %cst_29 [0] : vector<8x48xf32> to vector<48xf32>
    %97 = vector.shape_cast %96 : vector<48xf32> to vector<1x48xf32>
    %98 = vector.broadcast %97 : vector<1x48xf32> to vector<8x48xf32>
    %99 = arith.subf %95, %98 : vector<8x48xf32>
    %100 = math.exp %99 : vector<8x48xf32>
    %cst_30 = arith.constant dense<0.000000e+00> : vector<48xf32>
    %101 = vector.multi_reduction <add>, %100, %cst_30 [0] : vector<8x48xf32> to vector<48xf32>
    %102 = vector.shape_cast %101 : vector<48xf32> to vector<1x48xf32>
    %103 = math.log %102 : vector<1x48xf32>
    %104 = vector.broadcast %103 : vector<1x48xf32> to vector<8x48xf32>
    %105 = arith.subf %99, %104 : vector<8x48xf32>
    %106 = vector.extract_strided_slice %105 {offsets = [0, 0], sizes = [5, 48], strides = [1, 1]} : vector<8x48xf32> to vector<5x48xf32>
    %107 = vector.shape_cast %106 : vector<5x48xf32> to vector<1x5x48xf32>
    %c0_31 = arith.constant 0 : index
    %c0_32 = arith.constant 0 : index
    %c0_33 = arith.constant 0 : index
    %108 = vector.load %arg7[%c0_31, %c0_32, %c0_33] : memref<1x5x48xf32, #tpu.memory_space<vmem>>, vector<1x5x48xf32>
    tpu.vector_store %arg7[%c0_31, %c0_32, %c0_33], %107 {strides = array<i32>} : memref<1x5x48xf32, #tpu.memory_space<vmem>>, vector<1x5x48xf32>,
    return
  }
  func.func @transform_0(%arg0: i32) -> (i32, i32, i32) {
    %c0_i32 = arith.constant 0 : i32
    %c0_i32_0 = arith.constant 0 : i32
    %c0_i32_1 = arith.constant 0 : i32
    return %arg0, %c0_i32, %c0_i32_0 : i32, i32, i32
  }
  func.func @transform_1(%arg0: i32) -> (i32, i32) {
    %c0_i32 = arith.constant 0 : i32
    %c0_i32_0 = arith.constant 0 : i32
    %c0_i32_1 = arith.constant 0 : i32
    return %c0_i32, %c0_i32_0 : i32, i32
  }
  func.func @transform_2(%arg0: i32) -> (i32, i32) {
    %c0_i32 = arith.constant 0 : i32
    %c0_i32_0 = arith.constant 0 : i32
    %c0_i32_1 = arith.constant 0 : i32
    return %c0_i32, %c0_i32_0 : i32, i32
  }
  func.func @transform_3(%arg0: i32) -> (i32, i32) {
    %c0_i32 = arith.constant 0 : i32
    %c0_i32_0 = arith.constant 0 : i32
    %c0_i32_1 = arith.constant 0 : i32
    return %c0_i32, %c0_i32_0 : i32, i32
  }
  func.func @transform_4(%arg0: i32) -> (i32, i32) {
    %c0_i32 = arith.constant 0 : i32
    %c0_i32_0 = arith.constant 0 : i32
    %c0_i32_1 = arith.constant 0 : i32
    return %c0_i32, %c0_i32_0 : i32, i32
  }
  func.func @transform_5(%arg0: i32) -> (i32, i32) {
    %c0_i32 = arith.constant 0 : i32
    %c0_i32_0 = arith.constant 0 : i32
    %c0_i32_1 = arith.constant 0 : i32
    return %c0_i32, %c0_i32_0 : i32, i32
  }
  func.func @transform_6(%arg0: i32) -> (i32, i32, i32) {
    %c0_i32 = arith.constant 0 : i32
    %c0_i32_0 = arith.constant 0 : i32
    %c0_i32_1 = arith.constant 0 : i32
    return %arg0, %c0_i32, %c0_i32_0 : i32, i32, i32
  }
}

</mosaic_0001>

<bundles_post_ra>
// kernel: tpu_custom_call.1
= control target key start
LH: loop header
LB: loop body
LE: loop exit
PB: predicated region body
PF: predicated region fallthrough
CT: control target
= control target key end

     0   :  { %vm86_vm0 = vcmask 1043456   ;;  %vm61_vm1 = vcmask 31744   ;;  %s1074_s14 = smov 48   ;;  %v1075_v13 = vmov 0   ;;  %vm195_vm2 = vcmask 1047936   ;;  %s1076_s18 = smov 81   ;;  %s1361_s0 = inlined_call_operand.vmem [shape: f32[1,4,48], index: 0, kind: input, shape index: {}]   ;;  %s1362_s1 = inlined_call_operand.vmem [shape: f32[64,4], index: 1, kind: input, shape index: {}]   ;;  %s1363_s5 = inlined_call_operand.vmem [shape: f32[56,1], index: 5, kind: input, shape index: {}]   ;;  %s1364_s2 = inlined_call_operand.vmem [shape: f32[96,16], index: 2, kind: input, shape index: {}]   ;;  %s1365_s3 = inlined_call_operand.vmem [shape: f32[64,16], index: 3, kind: input, shape index: {}]   ;;  %s1366_s4 = inlined_call_operand.vmem [shape: f32[8,32], index: 4, kind: input, shape index: {}]   ;;  %s1367_s6 = inlined_call_operand.vmem [shape: f32[1,5,48], index: 6, kind: output, shape index: {}]  }
   0x1   :  { %v23_v0 = vld [vmem:[%s1361_s0] sm:$0xf]  ;;  %v54_v2 = vld [vmem:[%s1362_s1 + $0x8] sm:$0xff]  ;;  %v55_v3 = vld [vmem:[%s1362_s1 + $0x10] sm:$0xff]  ;;  %1037 = vset.pattern.permute.xlu1 %v1075_v13  ;;  %1036 = vset.pattern.permute.xlu0 %v1075_v13  ;;  %s1077_s19 = smov 127   ;;  %vm300_vm3 = vcmask 130048   ;;  %v24_v38 = vlaneseq }
   0x2   :  { %v53_v1 = vld [vmem:[%s1362_s1] sm:$0xff]  ;;  %935 = vmatprep.subr.msk.mxu0 %vm86_vm0, %v23_v0  ;;  %v56_v4 = vld [vmem:[%s1362_s1 + $0x18] sm:$0xff]  ;;  %v58_v6 = vld [vmem:[%s1362_s1 + $0x28] sm:$0xff]  ;;  %vm1080_vm11 = vmmov 0   ;;  %vm753_vm12 = vcmask 261120   ;;  %vm827_vm13 = vcmask 392192  }
   0x3   :  { %937 = vmatprep.mubr.msk.f32.mxu0 %vm61_vm1, %v53_v1  ;;  %936 = vmatpush3.msk.msra.mxu0 %vm86_vm0, %v23_v0  ;;  %v57_v5 = vld [vmem:[%s1362_s1 + $0x20] sm:$0xff]  ;;  %v59_v7 = vld [vmem:[%s1362_s1 + $0x30] sm:$0xff]  ;;  %v60_v8 = vld [vmem:[%s1362_s1 + $0x38] sm:$0xff]  ;;  %v25_v39 = vand.u32 127, %v24_v38  ;;  %vm848_vm14 = vcmask 389120  }
   0x4   :  { %938 = vmatmul.mubr.msk.f32.vlgmr.msra.gmra.mrb[0].mxu0 %vm61_vm1, %v54_v2  ;;  %v46_v24 = vld [vmem:[%s1363_s5] sm:$0xff]  ;;  %v47_v27 = vld [vmem:[%s1363_s5 + $0x8] sm:$0xff]  ;;  %v469_v38 = vld [vmem:[%s1365_s3 + $0x38] sm:$0xff] }
   0x5   :  { %940 = vmatprep.mubr.msk.f32.mxu0 %vm61_vm1, %v55_v3  ;;  %v288_v36 = vld [vmem:[%s1364_s2] sm:$0xff]  ;;  %v1188_v41 = vmul.u32.u64.low 2863311531, %v25_v39  ;;  %v1189_v42 = vmul.u32.u64.high 2863311531, %v25_v39, %v1188_v41 }
   0x6   :  { %953 = vmatprep.mubr.msk.f32.mxu1 %vm300_vm3, %v288_v36  ;;  %v462_v37 = vld [vmem:[%s1365_s3] sm:$0xff]  ;;  %v299_v36 = vld [vmem:[%s1364_s2 + $0x58] sm:$0xff] }
   0x7   :  { %v32_v50 = vshrl.u32 %v1189_v42, 2 }
   0x8   :  { %941 = vmatmul.mubr.msk.f32.gmra.mrb[2].mxu0 %vm61_vm1, %v56_v4 }
   0x9   :  { %943 = vmatprep.mubr.msk.f32.mxu0 %vm61_vm1, %v57_v5  ;;  %v33_v55 = vmul.u32 6, %v32_v50 }
   0xb   :  { %v34_v60 = vsub.s32 %v25_v39, %v33_v55 }
   0xc   :  { %944 = vmatmul.mubr.msk.f32.gmra.mrb[4].mxu0 %vm61_vm1, %v58_v6 }
   0xd   :  { %946 = vmatprep.mubr.msk.f32.mxu0 %vm61_vm1, %v59_v7  ;;  %vm37_vm4 = vcmp.ne.s32.totalorder %v34_v60, 0  ;;  %vm38_vm5 = vcmp.lt.s32.totalorder %v34_v60, 0  ;;  %v40_v1 = vadd.s32 6, %v34_v60 }
   0xe   :  { %vm39_vm6 = vmand %vm38_vm5, %vm37_vm4 }
   0xf   :  { %v41_v4 = vsel %vm39_vm6, %v40_v1, %v34_v60 }
  0x10   :  { %947 = vmatmul.mubr.msk.f32.gmra.mrb[6].mxu0 %vm61_vm1, %v60_v8  ;;  %v854_v7 = vadd.s32 4294967295, %v41_v4 }
  0x11   :  { %975 = vmatprep.mubr.msk.f32.mxu0 %vm300_vm3, %v462_v37  ;;  %v468_v37 = vld [vmem:[%s1365_s3 + $0x30] sm:$0xff] }
  0x12   :  { %vm43_vm7 = vcmp.ge.s32.totalorder %v854_v7, 0  ;;  %vm44_vm8 = vcmp.lt.s32.totalorder %v854_v7, 4 }
  0x13   :  { %vm45_vm9 = vmand %vm43_vm7, %vm44_vm8 }
  0x14   :  { %vm1194_vm10 = vmpackc.low %vm45_vm9, %vm45_vm9 }
  0xd7   :  { %v1152_v9 = vpop.f32.mrb[0].mxu0 }
  0xd8   :  { %v156_v10 = vpop.f32.mrb[1].mxu0 }
  0xdb   :  { %v942_v11 = vpop.f32.mrb[2].mxu0 }
  0xdc   :  { %v166_v12 = vpop.f32.mrb[3].mxu0 }
  0xdd   :  { %196 = vrot.lane.b32.xlu0 %v166_v12, %s1074_s14 }
  0xdf   :  { %v1155_v14 = vpop.f32.mrb[4].mxu0 }
  0xe0   :  { %v176_v15 = vpop.f32.mrb[5].mxu0 }
  0xe1   :  { %199 = vrot.lane.b32.xlu0 %v942_v11, %s1074_s14 }
  0xe3   :  { %v948_v16 = vpop.f32.mrb[6].mxu0 }
  0xe4   :  { %v186_v17 = vpop.f32.mrb[7].mxu0 }
  0xe5   :  { %230 = vrot.lane.b32.xlu1 %v186_v17, %s1074_s14 }
  0xe9   :  { %233 = vrot.lane.b32.xlu1 %v948_v16, %s1074_s14 }
 0x14f   :  { %v197_v18 = vpop.permute.xlu0 %196 }
 0x150   :  { %v198_v19 = vsel %vm195_vm2, %v197_v18, %v166_v12  ;;  %v290_v18 = vld [vmem:[%s1364_s2 + $0x10] sm:$0xff] }
 0x151   :  { %202 = vrot.lane.b32.xlu0 %v198_v19, %s1074_s14 }
 0x153   :  { %v200_v20 = vpop.permute.xlu0 %199 }
 0x154   :  { %v201_v21 = vsel %vm195_vm2, %v200_v20, %v942_v11 }
 0x155   :  { %204 = vrot.lane.b32.xlu1 %v201_v21, %s1074_s14 }
 0x157   :  { %v231_v22 = vpop.permute.xlu1 %230 }
 0x158   :  { %v232_v23 = vsel %vm195_vm2, %v231_v22, %v186_v17  ;;  %v291_v22 = vld [vmem:[%s1364_s2 + $0x18] sm:$0xff] }
 0x159   :  { %236 = vrot.lane.b32.xlu0 %v232_v23, %s1074_s14 }
 0x15b   :  { %v234_v25 = vpop.permute.xlu1 %233 }
 0x15c   :  { %v235_v26 = vsel %vm195_vm2, %v234_v25, %v948_v16  ;;  %v293_v25 = vld [vmem:[%s1364_s2 + $0x28] sm:$0xff] }
 0x15d   :  { %238 = vrot.lane.b32.xlu1 %v235_v26, %s1074_s14  ;;  %220 = vperm.xlu0 %1036, %v46_v24   ;;  %v292_v24 = vld [vmem:[%s1364_s2 + $0x20] sm:$0xff]  ;;  %v463_v26 = vld [vmem:[%s1365_s3 + $0x8] sm:$0xff] }
 0x161   :  { %225 = vperm.xlu1 %1037, %v47_v27   ;;  %v294_v27 = vld [vmem:[%s1364_s2 + $0x30] sm:$0xff] }
 0x1c3   :  { %v203_v28 = vpop.permute.xlu0 %202 }
 0x1c4   :  { %v206_v29 = vsel %vm195_vm2, %v203_v28, %v166_v12  ;;  %v464_v28 = vld [vmem:[%s1365_s3 + $0x10] sm:$0xff] }
 0x1c5   :  { %210 = vrot.lane.b32.xlu1 %v206_v29, %s1076_s18  ;;  %v295_v29 = vld [vmem:[%s1364_s2 + $0x38] sm:$0xff] }
 0x1c7   :  { %v205_v30 = vpop.permute.xlu1 %204 }
 0x1c8   :  { %v207_v31 = vsel %vm195_vm2, %v205_v30, %v942_v11  ;;  %v465_v30 = vld [vmem:[%s1365_s3 + $0x18] sm:$0xff] }
 0x1c9   :  { %212 = vrot.lane.b32.xlu0 %v207_v31, %s1076_s18  ;;  %v296_v31 = vld [vmem:[%s1364_s2 + $0x40] sm:$0xff] }
 0x1cb   :  { %v237_v32 = vpop.permute.xlu0 %236 }
 0x1cc   :  { %v240_v33 = vsel %vm195_vm2, %v237_v32, %v186_v17  ;;  %v289_v17 = vld [vmem:[%s1364_s2 + $0x8] sm:$0xff]  ;;  %v466_v32 = vld [vmem:[%s1365_s3 + $0x20] sm:$0xff] }
 0x1cd   :  { %244 = vrot.lane.b32.xlu1 %v240_v33, %s1077_s19  ;;  %v297_v33 = vld [vmem:[%s1364_s2 + $0x48] sm:$0xff] }
 0x1cf   :  { %v239_v34 = vpop.permute.xlu1 %238 }
 0x1d0   :  { %v241_v35 = vsel %vm195_vm2, %v239_v34, %v948_v16  ;;  %v467_v34 = vld [vmem:[%s1365_s3 + $0x28] sm:$0xff] }
 0x1d1   :  { %246 = vrot.lane.b32.xlu0 %v241_v35, %s1077_s19  ;;  %v298_v35 = vld [vmem:[%s1364_s2 + $0x50] sm:$0xff] }
 0x1dc   :  { %v221_v43 = vpop.permute.xlu0 %220 }
 0x1e0   :  { %v226_v40 = vpop.permute.xlu1 %225 }
 0x237   :  { %v211_v44 = vpop.permute.xlu1 %210 }
 0x238   :  { %v216_v45 = vadd.f32 %v211_v44, %v156_v10 }
 0x23a   :  { %v228_v46 = vadd.f32 %v221_v43, %v216_v45 }
 0x23b   :  { %v213_v47 = vpop.permute.xlu0 %212 }
 0x23c   :  { %v864_v48 = vmul.f32 -1.442695, %v228_v46  ;;  %v217_v49 = vadd.f32 %v1152_v9, %v213_v47 }
 0x23e   :  { %1038 = vpow2.f32 %v864_v48  ;;  %v229_v51 = vadd.f32 %v226_v40, %v217_v49 }
 0x23f   :  { %v245_v52 = vpop.permute.xlu1 %244 }
 0x240   :  { %v865_v53 = vmul.f32 -1.442695, %v229_v51  ;;  %v250_v54 = vadd.f32 %v245_v52, %v176_v15 }
 0x242   :  { %1040 = vpow2.f32 %v865_v53  ;;  %v252_v56 = vadd.f32 %v250_v54, %v221_v43 }
 0x243   :  { %v247_v57 = vpop.permute.xlu0 %246 }
 0x244   :  { %v866_v58 = vmul.f32 -1.442695, %v252_v56  ;;  %v251_v59 = vadd.f32 %v1155_v14, %v247_v57 }
 0x246   :  { %1042 = vpow2.f32 %v866_v58  ;;  %v253_v61 = vadd.f32 %v251_v59, %v226_v40 }
 0x248   :  { %v1039_v62 = vpop.eup %1038  ;;  %v867_v63 = vmul.f32 -1.442695, %v253_v61 }
 0x249   :  { %v260_v0 = vadd.f32 1.0, %v1039_v62 }
 0x24a   :  { %1044 = vpow2.f32 %v867_v63 }
 0x24b   :  { %1046 = vrcp.f32 %v260_v0 }
 0x24c   :  { %v1041_v2 = vpop.eup %1040 }
 0x24d   :  { %v261_v3 = vadd.f32 1.0, %v1041_v2 }
 0x24f   :  { %1048 = vrcp.f32 %v261_v3 }
 0x250   :  { %v1043_v5 = vpop.eup %1042 }
 0x251   :  { %v278_v6 = vadd.f32 1.0, %v1043_v5 }
 0x253   :  { %1050 = vrcp.f32 %v278_v6 }
 0x254   :  { %v1045_v8 = vpop.eup %1044 }
 0x255   :  { %v279_v9 = vadd.f32 1.0, %v1045_v8  ;;  %v1047_v10 = vpop.eup %1046 }
 0x256   :  { %v266_v12 = vmul.f32 %v1047_v10, %v228_v46 }
 0x257   :  { %1052 = vrcp.f32 %v279_v9 }
 0x259   :  { %v1049_v11 = vpop.eup %1048 }
 0x25a   :  { %v267_v13 = vmul.f32 %v1049_v11, %v229_v51 }
 0x25c   :  { %v998_v15 = vpack.c.bf16 %v267_v13, %v266_v12 }
 0x25d   :  { %v1051_v16 = vpop.eup %1050 }
 0x25e   :  { %1000 = vmatprep.subr.msk.bf16.mxu1 %vm1194_vm10, %v998_v15  ;;  %v284_v20 = vmul.f32 %v1051_v16, %v252_v56  ;;  %v48_v16 = vld [vmem:[%s1363_s5 + $0x10] sm:$0xff] }
 0x25f   :  { %1003 = vmatpush3.bf16.msk.msra.mxu1 %vm1194_vm10, %v998_v15  ;;  %v49_v15 = vld [vmem:[%s1363_s5 + $0x18] sm:$0xff] }
 0x261   :  { %v1053_v19 = vpop.eup %1052 }
 0x262   :  { %v285_v21 = vmul.f32 %v1053_v19, %v253_v61  ;;  %954 = vmatmul.mubr.msk.f32.vlgmr.msra.gmra.mrb[0].mxu1 %vm300_vm3, %v289_v17  ;;  %v51_v17 = vld [vmem:[%s1363_s5 + $0x28] sm:$0xff] }
 0x263   :  { %956 = vmatprep.mubr.msk.f32.mxu1 %vm300_vm3, %v290_v18  ;;  %v50_v18 = vld [vmem:[%s1363_s5 + $0x20] sm:$0xff] }
 0x264   :  { %v1004_v23 = vpack.c.bf16 %v285_v21, %v284_v20 }
 0x266   :  { %957 = vmatmul.mubr.msk.f32.gmra.mrb[2].mxu1 %vm300_vm3, %v291_v22  ;;  %1006 = vmatprep.subr.msk.bf16.mxu0 %vm1194_vm10, %v1004_v23 }
 0x267   :  { %1016 = vmatprep.subr.msk.bf16.mxu1 %vm1194_vm10, %v1004_v23  ;;  %1009 = vmatpush3.bf16.msk.msra.mxu0 %vm1194_vm10, %v1004_v23 }
 0x268   :  { %1017 = vmatpush3.bf16.msk.msra.mxu1 %vm1194_vm10, %v1004_v23  ;;  %959 = vmatprep.mubr.msk.f32.mxu1 %vm300_vm3, %v292_v24 }
 0x26a   :  { %960 = vmatmul.mubr.msk.f32.gmra.mrb[4].mxu1 %vm300_vm3, %v293_v25  ;;  %976 = vmatmul.mubr.msk.f32.vlgmr.msra.gmra.mrb[8].mxu0 %vm300_vm3, %v463_v26 }
 0x26b   :  { %962 = vmatprep.mubr.msk.f32.mxu1 %vm300_vm3, %v294_v27  ;;  %978 = vmatprep.mubr.msk.f32.mxu0 %vm300_vm3, %v464_v28 }
 0x26e   :  { %963 = vmatmul.mubr.msk.f32.gmra.mrb[6].mxu1 %vm300_vm3, %v295_v29  ;;  %979 = vmatmul.mubr.msk.f32.gmra.mrb[10].mxu0 %vm300_vm3, %v465_v30 }
 0x26f   :  { %965 = vmatprep.mubr.msk.f32.mxu1 %vm300_vm3, %v296_v31  ;;  %981 = vmatprep.mubr.msk.f32.mxu0 %vm300_vm3, %v466_v32 }
 0x272   :  { %966 = vmatmul.mubr.msk.f32.gmra.mrb[8].mxu1 %vm300_vm3, %v297_v33  ;;  %982 = vmatmul.mubr.msk.f32.gmra.mrb[12].mxu0 %vm300_vm3, %v467_v34 }
 0x273   :  { %968 = vmatprep.mubr.msk.f32.mxu1 %vm300_vm3, %v298_v35  ;;  %v52_v35 = vld [vmem:[%s1363_s5 + $0x30] sm:$0xff] }
 0x276   :  { %969 = vmatmul.mubr.msk.f32.gmra.mrb[10].mxu1 %vm300_vm3, %v299_v36  ;;  %v1079_v36 = vmov 0.0|0.0  }
 0x277   :  { %984 = vmatprep.mubr.msk.f32.mxu1 %vm300_vm3, %v468_v37  ;;  %1010 = vmatprep.subr.bf16.mxu0 %v1079_v36  ;;  %v1081_v37 = vmov 0.0  }
 0x278   :  { %995 = vmatprep.mubr.msk.f32.mxu0 %vm1080_vm11, %v1081_v37 }
 0x27a   :  { %985 = vmatmul.mubr.msk.f32.vlgmr.msra.gmra.mrb[6].mxu1 %vm300_vm3, %v469_v38 }
 0x335   :  { %v955_v39 = vpop.f32.mrb[0].mxu1 }
 0x336   :  { %v403_v40 = vpop.f32.mrb[1].mxu1 }
 0x339   :  { %v958_v41 = vpop.f32.mrb[2].mxu1 }
 0x33a   :  { %v413_v42 = vpop.f32.mrb[3].mxu1 }
 0x33d   :  { %v977_v43 = vpop.f32.mrb[8].mxu0  ;;  %v961_v44 = vpop.f32.mrb[4].mxu1 }
 0x33e   :  { %v1282_v45 = vadd.f32 %v977_v43, %v955_v39  ;;  %v560_v46 = vpop.f32.mrb[9].mxu0  ;;  %v423_v47 = vpop.f32.mrb[5].mxu1 }
 0x33f   :  { %v1284_v48 = vadd.f32 %v560_v46, %v403_v40 }
 0x341   :  { %v980_v49 = vpop.f32.mrb[10].mxu0 }
 0x342   :  { %v1286_v50 = vadd.f32 %v980_v49, %v958_v41  ;;  %v570_v51 = vpop.f32.mrb[11].mxu0 }
 0x343   :  { %v1288_v52 = vadd.f32 %v570_v51, %v413_v42 }
 0x345   :  { %v967_v53 = vpop.f32.mrb[8].mxu1  ;;  %v983_v54 = vpop.f32.mrb[12].mxu0 }
 0x346   :  { %v600_v55 = vadd.f32 %v983_v54, %v961_v44  ;;  %654 = vrot.lane.b32.xlu0 %v967_v53, %s1074_s14  ;;  %v443_v56 = vpop.f32.mrb[9].mxu1  ;;  %v580_v57 = vpop.f32.mrb[13].mxu0 }
 0x347   :  { %v599_v58 = vadd.f32 %v580_v57, %v423_v47  ;;  %651 = vrot.lane.b32.xlu1 %v443_v56, %s1074_s14 }
 0x349   :  { %v1292_v59 = vpop.f32.mrb[10].mxu1 }
 0x34a   :  { %610 = vrot.lane.b32.xlu0 %v600_v55, %s1074_s14  ;;  %v1295_v60 = vpop.f32.mrb[11].mxu1 }
 0x34b   :  { %607 = vrot.lane.b32.xlu1 %v599_v58, %s1074_s14 }
 0x34d   :  { %v986_v61 = vpop.f32.mrb[6].mxu1 }
 0x34e   :  { %v590_v62 = vpop.f32.mrb[7].mxu1  ;;  %616 = vrot.lane.b32.xlu0 %v986_v61, %s1074_s14 }
 0x34f   :  { %613 = vrot.lane.b32.xlu1 %v590_v62, %s1074_s14 }
 0x352   :  { %660 = vrot.lane.b32.xlu0 %v1292_v59, %s1074_s14 }
 0x353   :  { %657 = vrot.lane.b32.xlu1 %v1295_v60, %s1074_s14 }
 0x3b8   :  { %v655_v63 = vpop.permute.xlu0 %654 }
 0x3b9   :  { %v652_v0 = vpop.permute.xlu1 %651  ;;  %v656_v1 = vsel %vm195_vm2, %v655_v63, %v967_v53 }
 0x3ba   :  { %665 = vrot.lane.b32.xlu0 %v656_v1, %s1074_s14  ;;  %v653_v2 = vsel %vm195_vm2, %v652_v0, %v443_v56 }
 0x3bb   :  { %663 = vrot.lane.b32.xlu1 %v653_v2, %s1074_s14 }
 0x3bc   :  { %v611_v3 = vpop.permute.xlu0 %610 }
 0x3bd   :  { %v608_v4 = vpop.permute.xlu1 %607  ;;  %v612_v5 = vsel %vm195_vm2, %v611_v3, %v600_v55 }
 0x3be   :  { %621 = vrot.lane.b32.xlu0 %v612_v5, %s1074_s14  ;;  %v609_v6 = vsel %vm195_vm2, %v608_v4, %v599_v58 }
 0x3bf   :  { %619 = vrot.lane.b32.xlu1 %v609_v6, %s1074_s14 }
 0x3c0   :  { %v617_v7 = vpop.permute.xlu0 %616 }
 0x3c1   :  { %v614_v8 = vpop.permute.xlu1 %613  ;;  %v618_v9 = vsel %vm195_vm2, %v617_v7, %v986_v61 }
 0x3c2   :  { %625 = vrot.lane.b32.xlu0 %v618_v9, %s1074_s14  ;;  %v615_v10 = vsel %vm195_vm2, %v614_v8, %v590_v62 }
 0x3c3   :  { %623 = vrot.lane.b32.xlu1 %v615_v10, %s1074_s14 }
 0x3c4   :  { %v661_v11 = vpop.permute.xlu0 %660 }
 0x3c5   :  { %v658_v12 = vpop.permute.xlu1 %657  ;;  %v662_v13 = vsel %vm195_vm2, %v661_v11, %v1292_v59 }
 0x3c6   :  { %669 = vrot.lane.b32.xlu0 %v662_v13, %s1074_s14  ;;  %v659_v14 = vsel %vm195_vm2, %v658_v12, %v1295_v60 }
 0x3c7   :  { %667 = vrot.lane.b32.xlu1 %v659_v14, %s1074_s14  ;;  %s1078_s14 = smov 126  }
 0x3ca   :  { %702 = vperm.xlu0 %1036, %v49_v15  }
 0x3cb   :  { %697 = vperm.xlu1 %1037, %v48_v16  }
 0x3ce   :  { %712 = vperm.xlu0 %1036, %v51_v17  }
 0x3cf   :  { %707 = vperm.xlu1 %1037, %v50_v18  }
 0x42c   :  { %v666_v19 = vpop.permute.xlu0 %665 }
 0x42d   :  { %v664_v20 = vpop.permute.xlu1 %663  ;;  %v672_v21 = vsel %vm195_vm2, %v666_v19, %v967_v53 }
 0x42e   :  { %681 = vrot.lane.b32.xlu0 %v672_v21, %s1078_s14  ;;  %v671_v22 = vsel %vm195_vm2, %v664_v20, %v443_v56  ;;  %v747_v20 = vld [vmem:[%s1366_s4] sm:$0xff] }
 0x42f   :  { %679 = vrot.lane.b32.xlu1 %v671_v22, %s1078_s14 }
 0x430   :  { %v622_v23 = vpop.permute.xlu0 %621 }
 0x431   :  { %v620_v24 = vpop.permute.xlu1 %619  ;;  %v628_v25 = vsel %vm195_vm2, %v622_v23, %v600_v55 }
 0x432   :  { %637 = vrot.lane.b32.xlu0 %v628_v25, %s1077_s19  ;;  %v627_v26 = vsel %vm195_vm2, %v620_v24, %v599_v58 }
 0x433   :  { %635 = vrot.lane.b32.xlu1 %v627_v26, %s1077_s19 }
 0x434   :  { %v626_v27 = vpop.permute.xlu0 %625 }
 0x435   :  { %v624_v28 = vpop.permute.xlu1 %623  ;;  %v630_v29 = vsel %vm195_vm2, %v626_v27, %v986_v61 }
 0x436   :  { %641 = vrot.lane.b32.xlu0 %v630_v29, %s1077_s19  ;;  %v629_v30 = vsel %vm195_vm2, %v624_v28, %v590_v62 }
 0x437   :  { %639 = vrot.lane.b32.xlu1 %v629_v30, %s1077_s19 }
 0x438   :  { %v670_v31 = vpop.permute.xlu0 %669 }
 0x439   :  { %v668_v32 = vpop.permute.xlu1 %667  ;;  %v674_v33 = vsel %vm195_vm2, %v670_v31, %v1292_v59 }
 0x43a   :  { %685 = vrot.lane.b32.xlu0 %v674_v33, %s1078_s14  ;;  %v673_v34 = vsel %vm195_vm2, %v668_v32, %v1295_v60 }
 0x43b   :  { %683 = vrot.lane.b32.xlu1 %v673_v34, %s1078_s14 }
 0x43f   :  { %750 = vperm.xlu1 %1037, %v52_v35  }
 0x449   :  { %v703_v38 = vpop.permute.xlu0 %702 }
 0x44a   :  { %v698_v39 = vpop.permute.xlu1 %697 }
 0x44d   :  { %v713_v40 = vpop.permute.xlu0 %712 }
 0x44e   :  { %v708_v41 = vpop.permute.xlu1 %707 }
 0x4a0   :  { %v682_v42 = vpop.permute.xlu0 %681 }
 0x4a1   :  { %v680_v43 = vpop.permute.xlu1 %679 }
 0x4a4   :  { %v638_v44 = vpop.permute.xlu0 %637 }
 0x4a5   :  { %v648_v46 = vadd.f32 %v638_v44, %v1282_v45  ;;  %v636_v47 = vpop.permute.xlu1 %635 }
 0x4a6   :  { %v647_v49 = vadd.f32 %v636_v47, %v1284_v48 }
 0x4a7   :  { %v692_v51 = vadd.f32 %v682_v42, %v648_v46 }
 0x4a8   :  { %v691_v53 = vadd.f32 %v680_v43, %v647_v49  ;;  %v642_v54 = vpop.permute.xlu0 %641 }
 0x4a9   :  { %v716_v55 = vadd.f32 %v703_v38, %v692_v51  ;;  %v640_v56 = vpop.permute.xlu1 %639  ;;  %v650_v59 = vadd.f32 %v642_v54, %v1286_v50 }
 0x4aa   :  { %v715_v57 = vadd.f32 %v698_v39, %v691_v53  ;;  %v649_v61 = vadd.f32 %v640_v56, %v1288_v52 }
 0x4ab   :  { %v893_v58 = vmul.f32 -1.442695, %v716_v55 }
 0x4ac   :  { %v892_v60 = vmul.f32 -1.442695, %v715_v57  ;;  %v686_v62 = vpop.permute.xlu0 %685 }
 0x4ad   :  { %1054 = vpow2.f32 %v893_v58  ;;  %v694_v63 = vadd.f32 %v686_v62, %v650_v59  ;;  %v684_v0 = vpop.permute.xlu1 %683 }
 0x4ae   :  { %1056 = vpow2.f32 %v892_v60  ;;  %v693_v45 = vadd.f32 %v684_v0, %v649_v61 }
 0x4af   :  { %v718_v1 = vadd.f32 %v713_v40, %v694_v63 }
 0x4b0   :  { %v717_v48 = vadd.f32 %v708_v41, %v693_v45 }
 0x4b1   :  { %v895_v2 = vmul.f32 -1.442695, %v718_v1 }
 0x4b2   :  { %v894_v3 = vmul.f32 -1.442695, %v717_v48 }
 0x4b3   :  { %1058 = vpow2.f32 %v895_v2 }
 0x4b4   :  { %1060 = vpow2.f32 %v894_v3 }
 0x4b7   :  { %v1055_v4 = vpop.eup %1054 }
 0x4b8   :  { %v1057_v5 = vpop.eup %1056  ;;  %v732_v6 = vadd.f32 1.0, %v1055_v4 }
 0x4b9   :  { %v731_v7 = vadd.f32 1.0, %v1057_v5 }
 0x4ba   :  { %1062 = vrcp.f32 %v732_v6 }
 0x4bb   :  { %1064 = vrcp.f32 %v731_v7 }
 0x4bd   :  { %v1059_v50 = vpop.eup %1058 }
 0x4be   :  { %v1061_v52 = vpop.eup %1060  ;;  %v734_v8 = vadd.f32 1.0, %v1059_v50  ;;  %v751_v21 = vpop.permute.xlu1 %750 }
 0x4bf   :  { %v733_v9 = vadd.f32 1.0, %v1061_v52 }
 0x4c0   :  { %1066 = vrcp.f32 %v734_v8 }
 0x4c1   :  { %1068 = vrcp.f32 %v733_v9 }
 0x4c4   :  { %v1063_v10 = vpop.eup %1062 }
 0x4c5   :  { %v1065_v11 = vpop.eup %1064  ;;  %v744_v12 = vmul.f32 %v1063_v10, %v716_v55 }
 0x4c6   :  { %v743_v13 = vmul.f32 %v1065_v11, %v715_v57 }
 0x4c8   :  { %v1011_v14 = vpack.c.bf16 %v744_v12, %v743_v13 }
 0x4ca   :  { %v1067_v15 = vpop.eup %1066  ;;  %1012 = vmatpush3.bf16.msra.mxu0 %v1011_v14 }
 0x4cb   :  { %v1069_v16 = vpop.eup %1068  ;;  %v746_v17 = vmul.f32 %v1067_v15, %v718_v1  ;;  %1013 = vmatprep.subr.bf16.mxu0 %v1079_v36 }
 0x4cc   :  { %v745_v18 = vmul.f32 %v1069_v16, %v717_v48 }
 0x4ce   :  { %v1014_v19 = vpack.c.bf16 %v746_v17, %v745_v18 }
 0x4d0   :  { %1015 = vmatpush3.bf16.msra.mxu0 %v1014_v19 }
 0x4d3   :  { %996 = vmatmul.mubr.msk.f32.vlgmr.msra.gmra.mrb[14].mxu0 %vm753_vm12, %v747_v20 }
 0x5a6   :  { %v823_v22 = vpop.f32.mrb[14].mxu0 }
 0x5a7   :  { %v824_v23 = vadd.f32 %v823_v22, %v751_v21  ;;  %v997_v24 = vpop.f32.mrb[15].mxu0 }
 0x5a9   :  { %v828_v25 = vsel %vm827_vm13, %v824_v23, -inf }
 0x5aa   :  { %v829_v26 = vrot.slane %v828_v25, 4 }
 0x5ac   :  { %v830_v27 = vmax.f32 %v828_v25, %v829_v26 }
 0x5ae   :  { %v831_v28 = vrot.slane %v830_v27, 2 }
 0x5b0   :  { %v832_v29 = vmax.f32 %v830_v27, %v831_v28 }
 0x5b2   :  { %v833_v30 = vrot.slane %v832_v29, 1 }
 0x5b4   :  { %v834_v31 = vmax.f32 %v832_v29, %v833_v30 }
 0x5b6   :  { %v835_v32 = vsub.f32 %v824_v23, %v834_v31 }
 0x5b8   :  { %v836_v33 = vmul.f32 1.442695, %v835_v32 }
 0x5ba   :  { %1070 = vpow2.f32 %v836_v33 }
 0x5c4   :  { %v1071_v34 = vpop.eup %1070 }
 0x5c5   :  { %v838_v35 = vsel %vm827_vm13, %v1071_v34, 0.0 }
 0x5c6   :  { %v839_v36 = vrot.slane %v838_v35, 4 }
 0x5c8   :  { %v840_v37 = vadd.f32 %v839_v36, %v838_v35 }
 0x5ca   :  { %v841_v38 = vrot.slane %v840_v37, 2 }
 0x5cc   :  { %v842_v39 = vadd.f32 %v841_v38, %v840_v37 }
 0x5ce   :  { %v843_v40 = vrot.slane %v842_v39, 1 }
 0x5d0   :  { %v844_v41 = vadd.f32 %v843_v40, %v842_v39 }
 0x5d2   :  { %1072 = vlog2.f32 %v844_v41 }
 0x5dc   :  { %v1073_v42 = vpop.eup %1072 }
 0x5dd   :  { %v846_v43 = vmul.f32 0.6931472, %v1073_v42 }
 0x5df   :  { %v847_v44 = vsub.f32 %v835_v32, %v846_v43 }
 0x5e1   :  { %849 = vst.msk [vmem:[%s1367_s6] sm:$0x1f] %vm848_vm14, %v847_v44 }

</bundles_post_ra>
